<compile_context>
chip_gen: v7x
topology: tpu7x:2x2x1
jax: 0.10.0
libtpu: 0.0.40
codegen_flags: <defaults>
</compile_context>

<pallas_src>
import jax
import jax.numpy as jnp
from jax.experimental import pallas as pl
from jax.experimental.pallas import tpu as pltpu


_SOFTPLUS_THRESHOLD = 20.0


def _mish_kernel(x_ref, o_ref):
    x = x_ref[...].astype(jnp.float32)
    # PyTorch softplus uses threshold=20 (linear above); tanh(x > 20) == 1.0 in
    # f32, so Mish(x > 20) == x.  One compare serves both clamp and select.
    gt = x > _SOFTPLUS_THRESHOLD
    e = jnp.exp(jnp.where(gt, _SOFTPLUS_THRESHOLD, x))       # single EUP exp
    # tanh(softplus(x)) = (e^2 + 2e) / (e^2 + 2e + 2) = 1 - 2/den
    den = e * (e + 2.0) + 2.0                                # >= 2: no div-by-0
    r = pl.reciprocal(den, approx=True)                      # EUP approx recip
    r = r * (2.0 - den * r)                                  # one Newton step (VPU)
    t = 1.0 - (r + r)
    t = jnp.where(gt, 1.0, t)
    o_ref[...] = (x * t).astype(o_ref.dtype)


def _choose_cols(n):
    # Largest lane-dense width (multiple of 128) that divides n exactly, so the
    # wrapper reshape is a free bitcast and no pad/slice HBM passes are needed.
    for c in (2048, 1024, 512, 384, 256, 128):
        if n % c == 0:
            return c, False
    return 512, True


def mish(x, *, target_block_bytes=2 * 1024 * 1024, min_grid_steps=8):
    """Elementwise Mish for an arbitrarily shaped array (any rank, f32/bf16)."""
    orig_shape = x.shape
    dtype = x.dtype
    itemsize = jnp.dtype(dtype).itemsize
    flat = x.reshape(-1)
    n = flat.shape[0]
    if n == 0:
        return x

    cols, needs_pad = _choose_cols(n)
    rows = pl.cdiv(n, cols)
    if needs_pad:
        flat = jnp.pad(flat, (0, rows * cols - n))   # mish(0)=0; padding harmless
    x2 = flat.reshape(rows, cols)

    # Sub-32-bit dtypes pack along sublanes: (16,128) bf16 tile, (32,128) int8.
    row_align = {4: 8, 2: 16, 1: 32}.get(itemsize, 8)

    if rows <= row_align:
        br = rows                                     # single full-extent block
    else:
        # ~target_block_bytes per step, multiple of the sublane tile.
        br = max(row_align,
                 (target_block_bytes // (cols * itemsize)) // row_align * row_align)
        # Keep >= min_grid_steps grid steps when possible so v7x's two
        # TensorCores both get work (no-op cost on v5e/v6e).
        cap = pl.cdiv(pl.cdiv(rows, min_grid_steps), row_align) * row_align
        br = min(br, max(row_align, cap))

    grid = (pl.cdiv(rows, br),)

    cost = pl.CostEstimate(
        flops=10 * n,
        transcendentals=2 * n,
        bytes_accessed=2 * n * itemsize,
    )

    out2 = pl.pallas_call(
        _mish_kernel,
        out_shape=jax.ShapeDtypeStruct((rows, cols), dtype),
        grid_spec=pltpu.PrefetchScalarGridSpec(
            num_scalar_prefetch=0,
            grid=grid,
            in_specs=[pl.BlockSpec((br, cols), lambda i: (i, 0))],
            out_specs=pl.BlockSpec((br, cols), lambda i: (i, 0)),
        ),
        compiler_params=pltpu.CompilerParams(
            dimension_semantics=("parallel",)),       # megacore-shardable on v7x
        cost_estimate=cost,
    )(x2)

    out = out2.reshape(-1)
    if needs_pad:
        out = out[:n]
    return out.reshape(orig_shape)


def mish_reference(x):
    # Pure-JAX reference of the PyTorch forward: x * tanh(F.softplus(x)).
    xf = x.astype(jnp.float32)
    sp = jnp.where(xf > 20.0, xf, jnp.log1p(jnp.exp(jnp.minimum(xf, 20.0))))
    return xf * jnp.tanh(sp)


if __name__ == "__main__":
    key = jax.random.PRNGKey(0)
    k1, k2, k3, k4 = jax.random.split(key, 4)

    # 1) Shape consistent with PoseRegression feature maps (B, C, L); n is a
    #    multiple of 128 -> zero-copy (no pad / no slice) fast path.
    x1 = jax.random.normal(k1, (2, 16, 128), dtype=jnp.float32) * 3.0
    o1 = jax.block_until_ready(mish(x1))
    assert o1.shape == x1.shape
    assert jnp.allclose(o1, mish_reference(x1), atol=1e-3, rtol=1e-3)

    # 2) Odd, non-aligned shape with values past the softplus threshold:
    #    exercises the pad path and the x > 20 branch.
    x2 = jax.random.normal(k2, (5, 37), dtype=jnp.float32) * 15.0
    o2 = jax.block_until_ready(mish(x2))
    assert o2.shape == x2.shape
    assert jnp.allclose(o2, mish_reference(x2), atol=1e-3, rtol=1e-3)

    # 3) Ragged last row-block without padding (rows=10 not a multiple of the
    #    8-row block): exercises the masked-tail path.
    x3 = jax.random.normal(k3, (10, 16, 128), dtype=jnp.float32) * 4.0
    o3 = jax.block_until_ready(mish(x3))
    assert o3.shape == x3.shape
    assert jnp.allclose(o3, mish_reference(x3), atol=1e-3, rtol=1e-3)

    # 4) bf16 I/O (half the HBM bytes), f32 compute inside the kernel.
    x4 = (jax.random.normal(k4, (2, 4, 16, 16), dtype=jnp.float32) * 3.0
          ).astype(jnp.bfloat16)
    o4 = jax.block_until_ready(mish(x4))
    assert o4.shape == x4.shape and o4.dtype == jnp.bfloat16
    assert jnp.allclose(o4.astype(jnp.float32), mish_reference(x4),
                        atol=1e-1, rtol=2e-2)

    print("KERNEL_OK")
</pallas_src>

<mosaic_0001>
module attributes {stable_mosaic.version = 11 : i64} {
  func.func @_mish_kernel(%arg0: i32, %arg1: memref<2x2048xf32, #tpu.memory_space<vmem>>, %arg2: memref<2x2048xf32, #tpu.memory_space<vmem>>) attributes {dimension_semantics = [#tpu.dimension_semantics<parallel>], iteration_bounds = array<i64: 1>, scalar_prefetch = 0 : i64, scratch_operands = 0 : i64, tpu.core_type = #tpu.core_type<tc>, window_params = [{transform_indices = @transform_0, window_bounds = array<i64: 2, 2048>}, {transform_indices = @transform_1, window_bounds = array<i64: 2, 2048>}]} {
    %c0 = arith.constant 0 : index
    %c0_0 = arith.constant 0 : index
    %0 = vector.load %arg1[%c0, %c0_0] : memref<2x2048xf32, #tpu.memory_space<vmem>>, vector<2x2048xf32>
    %cst = arith.constant 2.000000e+01 : f32
    %1 = vector.broadcast %cst : f32 to vector<2x2048xf32>
    %2 = arith.cmpf ogt, %0, %1 : vector<2x2048xf32>
    %cst_1 = arith.constant 2.000000e+01 : f32
    %3 = vector.broadcast %cst_1 : f32 to vector<2x2048xf32>
    %4 = arith.select %2, %3, %0 : vector<2x2048xi1>, vector<2x2048xf32>
    %5 = math.exp %4 : vector<2x2048xf32>
    %cst_2 = arith.constant 2.000000e+00 : f32
    %6 = vector.broadcast %cst_2 : f32 to vector<2x2048xf32>
    %7 = arith.addf %5, %6 : vector<2x2048xf32>
    %8 = arith.mulf %5, %7 : vector<2x2048xf32>
    %cst_3 = arith.constant 2.000000e+00 : f32
    %9 = vector.broadcast %cst_3 : f32 to vector<2x2048xf32>
    %10 = arith.addf %8, %9 : vector<2x2048xf32>
    %11 = tpu.reciprocal %10 {approx = true} : vector<2x2048xf32> -> vector<2x2048xf32>
    %12 = arith.mulf %10, %11 : vector<2x2048xf32>
    %cst_4 = arith.constant 2.000000e+00 : f32
    %13 = vector.broadcast %cst_4 : f32 to vector<2x2048xf32>
    %14 = arith.subf %13, %12 : vector<2x2048xf32>
    %15 = arith.mulf %11, %14 : vector<2x2048xf32>
    %16 = arith.addf %15, %15 : vector<2x2048xf32>
    %cst_5 = arith.constant 1.000000e+00 : f32
    %17 = vector.broadcast %cst_5 : f32 to vector<2x2048xf32>
    %18 = arith.subf %17, %16 : vector<2x2048xf32>
    %cst_6 = arith.constant 1.000000e+00 : f32
    %19 = vector.broadcast %cst_6 : f32 to vector<2x2048xf32>
    %20 = arith.select %2, %19, %18 : vector<2x2048xi1>, vector<2x2048xf32>
    %21 = arith.mulf %0, %20 : vector<2x2048xf32>
    %c0_7 = arith.constant 0 : index
    %c0_8 = arith.constant 0 : index
    %22 = vector.load %arg2[%c0_7, %c0_8] : memref<2x2048xf32, #tpu.memory_space<vmem>>, vector<2x2048xf32>
    tpu.vector_store %arg2[%c0_7, %c0_8], %21 {strides = array<i32>} : memref<2x2048xf32, #tpu.memory_space<vmem>>, vector<2x2048xf32>,
    return
  }
  func.func @transform_0(%arg0: i32) -> (i32, i32) {
    %c0_i32 = arith.constant 0 : i32
    %c0_i32_0 = arith.constant 0 : i32
    return %arg0, %c0_i32 : i32, i32
  }
  func.func @transform_1(%arg0: i32) -> (i32, i32) {
    %c0_i32 = arith.constant 0 : i32
    %c0_i32_0 = arith.constant 0 : i32
    return %arg0, %c0_i32 : i32, i32
  }
}

</mosaic_0001>

<bundles_post_ra>
// kernel: tpu_custom_call.1
= control target key start
LH: loop header
LB: loop body
LE: loop exit
PB: predicated region body
PF: predicated region fallthrough
CT: control target
= control target key end

     0   :  { %6 = vsyncpa [#allocation3], 0  ;;  %s242_s0 = inlined_call_operand.hbm [shape: f32[2,2048], index: 0, kind: input, shape index: {}]   ;;  %s243_s1 = inlined_call_operand.hbm [shape: f32[2,2048], index: 1, kind: output, shape index: {}]  }
   0x1   :  { %7 = vsyncpa [#allocation4], 0  ;;  %s170_s6 = smov [#allocation2]   ;;  %s122_s10 = scalar_lea.hbm %s242_s0, 512 }
   0x2   :  { %s14_s7 = sshll.u32 %s170_s6, 4  ;;  %p123_p0 = scmp.ne.s32.totalorder %s242_s0, %s122_s10  ;;  %s15_s7 = int_to_ptr.vmem [resolvable:$true] %s14_s7 }
   0x3   :  { %p126_p1 = scmp.lt.u32.totalorder %s122_s10, %s242_s0 }
   0x5   :  { %p128_p2 = pnand %p126_p1, %p123_p0 }
   0x7   :  { %131 = shalt.err (!%p128_p2)
}
   0x8   :  { %s132_s15 = scalar_lea.vmem %s15_s7, 512  ;;  %p137_p4 = scmp.lt.s32.totalorder %s15_s7, %s15_s7 }
   0x9   :  { %p133_p3 = scmp.ne.s32.totalorder %s15_s7, %s132_s15  ;;  %p138_p5 = scmp.lt.s32.totalorder %s132_s15, %s132_s15 }
   0xb   :  { %p139_p6 = por %p138_p5, %p137_p4 }
   0xd   :  { %p140_p7 = pnand %p139_p6, %p133_p3 }
   0xf   :  { %143 = shalt.err (!%p140_p7)
}
  0x10   :  { %17 = dma.hbm_to_vmem [thread:$0]  %s242_s0, 512, %s15_s7, [#allocation3]  }
  0x11   :  { %166 = dma.done.wait [#allocation3], 512  }
  0x12   :  { %167 = vsyncadd [#allocation3], 4294966784  ;;  %v194_v0 = vld [vmem:[#allocation2] sm:$0xff]  ;;  %v196_v1 = vld [vmem:[#allocation2 + $0x8] sm:$0xff]  ;;  %s171_s0 = smov [#allocation5]  }
  0x13   :  { %v198_v2 = vld [vmem:[#allocation2 + $0x10] sm:$0xff]  ;;  %vm25_vm0 = vcmp.gt.f32.partialorder %v194_v0, 20.0  ;;  %vm26_vm1 = vcmp.gt.f32.partialorder %v196_v1, 20.0  ;;  %v203_v3 = vld [vmem:[#allocation2 + $0x18] sm:$0xff]  ;;  %s95_s18 = sshll.u32 %s171_s0, 4  ;;  %s96_s18 = int_to_ptr.vmem [resolvable:$true] %s95_s18 }
  0x14   :  { %vm27_vm2 = vcmp.gt.f32.partialorder %v198_v2, 20.0  ;;  %v29_v4 = vsel %vm25_vm0, 20.0, %v194_v0  ;;  %v30_v5 = vsel %vm26_vm1, 20.0, %v196_v1  ;;  %vm28_vm3 = vcmp.gt.f32.partialorder %v203_v3, 20.0  ;;  %s144_s19 = scalar_lea.vmem %s96_s18, 512  ;;  %p149_p9 = scmp.lt.s32.totalorder %s96_s18, %s96_s18 }
  0x15   :  { %v31_v6 = vsel %vm27_vm2, 20.0, %v198_v2  ;;  %v33_v7 = vmul.f32 1.442695, %v29_v4  ;;  %v35_v8 = vmul.f32 1.442695, %v30_v5  ;;  %v32_v10 = vsel %vm28_vm3, 20.0, %v203_v3  ;;  %p145_p8 = scmp.ne.s32.totalorder %s96_s18, %s144_s19  ;;  %p150_p10 = scmp.lt.s32.totalorder %s144_s19, %s144_s19 }
  0x16   :  { %v37_v9 = vmul.f32 1.442695, %v31_v6  ;;  %v39_v11 = vmul.f32 1.442695, %v32_v10 }
  0x17   :  { %106 = vpow2.f32 %v33_v7  ;;  %p151_p11 = por %p150_p10, %p149_p9 }
  0x18   :  { %108 = vpow2.f32 %v35_v8 }
  0x19   :  { %110 = vpow2.f32 %v37_v9  ;;  %p152_p12 = pnand %p151_p11, %p145_p8 }
  0x1a   :  { %112 = vpow2.f32 %v39_v11 }
  0x21   :  { %v107_v12 = vpop.eup %106 }
  0x22   :  { %v109_v13 = vpop.eup %108  ;;  %v41_v14 = vadd.f32 2.0, %v107_v12 }
  0x23   :  { %v111_v15 = vpop.eup %110  ;;  %v42_v16 = vadd.f32 2.0, %v109_v13 }
  0x24   :  { %v113_v17 = vpop.eup %112  ;;  %v45_v18 = vmul.f32 %v107_v12, %v41_v14  ;;  %v43_v19 = vadd.f32 2.0, %v111_v15 }
  0x25   :  { %v46_v20 = vmul.f32 %v109_v13, %v42_v16  ;;  %v44_v21 = vadd.f32 2.0, %v113_v17 }
  0x26   :  { %v49_v22 = vadd.f32 2.0, %v45_v18  ;;  %v47_v23 = vmul.f32 %v111_v15, %v43_v19 }
  0x27   :  { %v50_v24 = vadd.f32 2.0, %v46_v20  ;;  %v48_v25 = vmul.f32 %v113_v17, %v44_v21 }
  0x28   :  { %114 = vrcp.f32 %v49_v22  ;;  %v51_v26 = vadd.f32 2.0, %v47_v23 }
  0x29   :  { %116 = vrcp.f32 %v50_v24  ;;  %v52_v27 = vadd.f32 2.0, %v48_v25 }
  0x2a   :  { %118 = vrcp.f32 %v51_v26 }
  0x2b   :  { %120 = vrcp.f32 %v52_v27 }
  0x32   :  { %v115_v28 = vpop.eup %114 }
  0x33   :  { %v117_v29 = vpop.eup %116  ;;  %v57_v30 = vmul.f32 %v115_v28, %v49_v22 }
  0x34   :  { %v119_v31 = vpop.eup %118  ;;  %v58_v32 = vmul.f32 %v117_v29, %v50_v24 }
  0x35   :  { %v121_v33 = vpop.eup %120  ;;  %v61_v34 = vsub.f32 2.0, %v57_v30  ;;  %v59_v35 = vmul.f32 %v119_v31, %v51_v26 }
  0x36   :  { %v62_v36 = vsub.f32 2.0, %v58_v32  ;;  %v60_v37 = vmul.f32 %v121_v33, %v52_v27 }
  0x37   :  { %v65_v38 = vmul.f32 %v115_v28, %v61_v34  ;;  %v63_v39 = vsub.f32 2.0, %v59_v35 }
  0x38   :  { %v66_v40 = vmul.f32 %v117_v29, %v62_v36  ;;  %v64_v41 = vsub.f32 2.0, %v60_v37 }
  0x39   :  { %v69_v42 = vadd.f32 %v65_v38, %v65_v38  ;;  %v67_v43 = vmul.f32 %v119_v31, %v63_v39 }
  0x3a   :  { %v70_v44 = vadd.f32 %v66_v40, %v66_v40  ;;  %v68_v45 = vmul.f32 %v121_v33, %v64_v41 }
  0x3b   :  { %v73_v46 = vsub.f32 1.0, %v69_v42  ;;  %v71_v47 = vadd.f32 %v67_v43, %v67_v43 }
  0x3c   :  { %v74_v48 = vsub.f32 1.0, %v70_v44  ;;  %v72_v49 = vadd.f32 %v68_v45, %v68_v45 }
  0x3d   :  { %v77_v50 = vsel %vm25_vm0, 1.0, %v73_v46  ;;  %v75_v51 = vsub.f32 1.0, %v71_v47 }
  0x3e   :  { %v81_v52 = vmul.f32 %v77_v50, %v194_v0  ;;  %v78_v53 = vsel %vm26_vm1, 1.0, %v74_v48  ;;  %v76_v54 = vsub.f32 1.0, %v72_v49 }
  0x3f   :  { %v82_v55 = vmul.f32 %v78_v53, %v196_v1  ;;  %v79_v56 = vsel %vm27_vm2, 1.0, %v75_v51 }
  0x40   :  { %85 = vst [vmem:[#allocation5] sm:$0xff] %v81_v52  ;;  %v83_v57 = vmul.f32 %v79_v56, %v198_v2  ;;  %v80_v58 = vsel %vm28_vm3, 1.0, %v76_v54 }
  0x41   :  { %86 = vst [vmem:[#allocation5 + $0x8] sm:$0xff] %v82_v55  ;;  %v84_v59 = vmul.f32 %v80_v58, %v203_v3 }
  0x42   :  { %87 = vst [vmem:[#allocation5 + $0x10] sm:$0xff] %v83_v57 }
  0x43   :  { %88 = vst [vmem:[#allocation5 + $0x18] sm:$0xff] %v84_v59 }
  0x44   :  { %155 = shalt.err (!%p152_p12)
}
  0x45   :  { %s156_s22 = scalar_lea.hbm %s243_s1, 512 }
  0x46   :  { %p157_p13 = scmp.ne.s32.totalorder %s243_s1, %s156_s22  ;;  %p160_p0 = scmp.lt.u32.totalorder %s156_s22, %s243_s1 }
  0x48   :  { %p162_p1 = pnand %p160_p0, %p157_p13 }
  0x4a   :  { %165 = shalt.err (!%p162_p1)
}
  0x4b   :  { %98 = dma.vmem_to_hbm [thread:$0]  %s96_s18, 512, %s243_s1, [#allocation4]  }
  0x4c   :  { %168 = dma.done.wait [#allocation4], 512  }
  0x4d   :  { %169 = vsyncadd [#allocation4], 4294966784 }
  0x4e   :  { %102 = vsyncpa [#allocation3], 1 }
  0x4f   :  { %103 = vsyncpa [#allocation4], 1 }

</bundles_post_ra>
